<compile_context>
chip_gen: v7x
topology: tpu7x:2x2x1
jax: 0.10.0
libtpu: 0.0.40
codegen_flags: <defaults>
</compile_context>

<pallas_src>
import functools

import jax
import jax.numpy as jnp
from jax.experimental import pallas as pl
from jax.experimental.pallas import tpu as pltpu


def _norm_kernel(x_ref, o_ref, *, eps, inv_h):
    # x_ref / o_ref: (TILE_T, H) VMEM tiles. Rows are independent, so garbage
    # rows in a partial final block are computed but their stores are masked.
    x = x_ref[...].astype(jnp.float32)
    ms = jnp.sum(x * x, axis=-1, keepdims=True) * inv_h   # mean(x^2), one XLU pass
    y = x * jax.lax.rsqrt(ms + eps)                        # rsqrt -> EUP slot
    o_ref[...] = y.astype(o_ref.dtype)                     # cast only at the store


def _round_up(n, m):
    return ((n + m - 1) // m) * m


def _round_down(n, m):
    return (n // m) * m


def _sublane_rows(dtype):
    # Packed sublane rows per vreg: 8 for 4-byte, 16 for 2-byte, 32 for 1-byte.
    return {4: 8, 2: 16, 1: 32}.get(jnp.dtype(dtype).itemsize, 8)


# Conservative resident-VMEM target; safe on v7x (64 MiB/TC) as well as
# v5e/v6e, and already enough to hit ~85%+ of HBM roofline per the tile sweep.
_VMEM_TARGET_BYTES = 24 << 20
_MAX_TILE_ROWS = 1024
_MIN_GRID_STEPS = 4


def _pick_tile(T, H, dtype):
    sublane = _sublane_rows(dtype)
    # Resident ~= 2 in bufs + 2 out bufs + f32 temps  ->  budget ~ target / 5
    # per block; the f32 upcast temp (4 B/elem) dominates the per-block size.
    block_budget = _VMEM_TARGET_BYTES // 5
    tile = _round_down(max(block_budget // (H * 4), sublane), sublane)
    tile = max(sublane, min(tile, _MAX_TILE_ROWS, _round_up(max(T, 1), sublane)))
    # Keep >= ~4 grid steps so the BlockSpec pipeline has something to
    # prefetch/write back against (never below one sublane group).
    if pl.cdiv(T, tile) < _MIN_GRID_STEPS:
        tile = min(tile, max(sublane, _round_up(pl.cdiv(max(T, 1), _MIN_GRID_STEPS),
                                                sublane)))
    return tile, sublane


def norm(x, *, eps=1e-12):
    """Pallas implementation of Norm.forward: x / sqrt(mean(x^2, -1) + eps)."""
    orig_shape = x.shape
    H = orig_shape[-1]
    T = 1
    for d in orig_shape[:-1]:
        T *= d
    x2 = x.reshape(T, H)

    itemsize = jnp.dtype(x.dtype).itemsize
    tile, _ = _pick_tile(T, H, x.dtype)
    # TODO(synk): for very large H where even a single-sublane-group block
    # exceeds the VMEM budget, add a chunked-H two-pass (accumulate sum(x*x)
    # over H chunks, then scale) instead of relying on a bigger VMEM limit.

    # Explicit scoped-VMEM limit: generous headroom over the estimated
    # residency, capped at 64 MiB so it is valid on v7x too.
    resident = tile * H * (4 * itemsize + 8)      # 2 in + 2 out bufs + f32 temps
    vmem_limit = int(min(64 << 20, max(2 * resident, 32 << 20)))

    # H a multiple of 128 keeps the store stream unmasked (lane-dense); that is
    # a caller-side layout choice (pad the hidden dim upstream, not per call).
    out = pl.pallas_call(
        functools.partial(_norm_kernel, eps=float(eps), inv_h=1.0 / H),
        out_shape=jax.ShapeDtypeStruct((T, H), x.dtype),
        grid_spec=pl.GridSpec(
            grid=(pl.cdiv(T, tile),),            # partial final block is masked
            in_specs=[pl.BlockSpec((tile, H), lambda i: (i, 0))],
            out_specs=pl.BlockSpec((tile, H), lambda i: (i, 0)),
        ),
        compiler_params=pltpu.CompilerParams(
            dimension_semantics=("parallel",),   # lets v7x shard tiles across TCs
            vmem_limit_bytes=vmem_limit,
        ),
        cost_estimate=pl.CostEstimate(
            flops=3 * T * H,
            transcendentals=T,
            bytes_accessed=2 * T * H * itemsize,
        ),
    )(x2)

    return out.reshape(orig_shape)


def _reference(x, eps=1e-12):
    xf = x.astype(jnp.float32)
    variance = jnp.mean(jnp.square(xf), axis=-1, keepdims=True)
    return xf / jnp.sqrt(variance + eps)


if __name__ == "__main__":
    eps = 1e-12
    key = jax.random.PRNGKey(0)

    # Case 1: f32, (batch, seq, hidden) consistent with the RoFormer module.
    B, S, H = 2, 8, 256
    x = jax.random.normal(key, (B, S, H), jnp.float32)
    out = jax.block_until_ready(norm(x, eps=eps))
    ref = _reference(x, eps=eps)
    assert out.shape == (B, S, H) and out.dtype == x.dtype
    assert jnp.allclose(out, ref, atol=1e-5, rtol=1e-5), "f32 mismatch vs. reference"

    # Case 2: bf16 with a row count that is not a multiple of the tile,
    # exercising the masked partial final block and the 16-row sublane packing.
    B2, S2, H2 = 2, 9, 128
    xb = jax.random.normal(jax.random.PRNGKey(1), (B2, S2, H2), jnp.float32)
    xb = xb.astype(jnp.bfloat16)
    outb = jax.block_until_ready(norm(xb, eps=eps))
    refb = _reference(xb, eps=eps)
    assert outb.shape == (B2, S2, H2) and outb.dtype == jnp.bfloat16
    assert jnp.allclose(outb.astype(jnp.float32), refb, atol=1e-2, rtol=1e-2), \
        "bf16 mismatch vs. reference"

    print("KERNEL_OK")
</pallas_src>

<mosaic_0001>
module attributes {stable_mosaic.version = 11 : i64} {
  func.func @_norm_kernel(%arg0: i32, %arg1: memref<8x256xf32, #tpu.memory_space<vmem>>, %arg2: memref<8x256xf32, #tpu.memory_space<vmem>>) attributes {dimension_semantics = [#tpu.dimension_semantics<parallel>], iteration_bounds = array<i64: 2>, scalar_prefetch = 0 : i64, scratch_operands = 0 : i64, tpu.core_type = #tpu.core_type<tc>, window_params = [{transform_indices = @transform_0, window_bounds = array<i64: 8, 256>}, {transform_indices = @transform_1, window_bounds = array<i64: 8, 256>}]} {
    %c0 = arith.constant 0 : index
    %c0_0 = arith.constant 0 : index
    %0 = vector.load %arg1[%c0, %c0_0] : memref<8x256xf32, #tpu.memory_space<vmem>>, vector<8x256xf32>
    %1 = arith.mulf %0, %0 : vector<8x256xf32>
    %cst = arith.constant dense<0.000000e+00> : vector<8xf32>
    %2 = vector.multi_reduction <add>, %1, %cst [1] : vector<8x256xf32> to vector<8xf32>
    %3 = vector.shape_cast %2 : vector<8xf32> to vector<8x1xf32>
    %cst_1 = arith.constant 3.906250e-03 : f32
    %4 = vector.broadcast %cst_1 : f32 to vector<8x1xf32>
    %5 = arith.mulf %3, %4 : vector<8x1xf32>
    %cst_2 = arith.constant 9.99999996E-13 : f32
    %6 = vector.broadcast %cst_2 : f32 to vector<8x1xf32>
    %7 = arith.addf %5, %6 : vector<8x1xf32>
    %8 = math.rsqrt %7 : vector<8x1xf32>
    %9 = vector.broadcast %8 : vector<8x1xf32> to vector<8x256xf32>
    %10 = arith.mulf %0, %9 : vector<8x256xf32>
    %c0_3 = arith.constant 0 : index
    %c0_4 = arith.constant 0 : index
    %11 = vector.load %arg2[%c0_3, %c0_4] : memref<8x256xf32, #tpu.memory_space<vmem>>, vector<8x256xf32>
    tpu.vector_store %arg2[%c0_3, %c0_4], %10 {strides = array<i32>} : memref<8x256xf32, #tpu.memory_space<vmem>>, vector<8x256xf32>,
    return
  }
  func.func @transform_0(%arg0: i32) -> (i32, i32) {
    %c0_i32 = arith.constant 0 : i32
    %c0_i32_0 = arith.constant 0 : i32
    return %arg0, %c0_i32 : i32, i32
  }
  func.func @transform_1(%arg0: i32) -> (i32, i32) {
    %c0_i32 = arith.constant 0 : i32
    %c0_i32_0 = arith.constant 0 : i32
    return %arg0, %c0_i32 : i32, i32
  }
}

</mosaic_0001>

<bundles_post_ra>
// kernel: tpu_custom_call.1
= control target key start
LH: loop header
LB: loop body
LE: loop exit
PB: predicated region body
PF: predicated region fallthrough
CT: control target
= control target key end

     0   :  { %6 = vsyncpa [#allocation3], 0  ;;  %s567_s0 = inlined_call_operand.hbm [shape: f32[16,256], index: 0, kind: input, shape index: {}]   ;;  %s568_s1 = inlined_call_operand.hbm [shape: f32[16,256], index: 1, kind: output, shape index: {}]  }
   0x1   :  { %8 = vsyncpa [#allocation3 + $0x1], 0 }
   0x2   :  { %9 = vsyncpa [#allocation4], 0 }
   0x3   :  { %11 = vsyncpa [#allocation4 + $0x1], 0  ;;  %s406_s6 = smov 0   ;;  %s408_s7 = smov 0  }
   0x4   :  { %s410_s8 = smov 0   ;;  %s412_s9 = smov 0  }
   0x5 LB: > { %s427_s10 = sadd.s32 4294967295, %s392_s9   ;;  %s232_s11 = sadd.s32 4294967294, %s392_s9   ;;  %s392_s9 = sphi %s412_s9, %s583_s9   ;;  %s388_s8 = sphi %s410_s8, %s582_s8   ;;  %s384_s7 = sphi %s408_s7, %s581_s7   ;;  %s380_s6 = sphi %s406_s6, %s580_s6  }
   0x6   : > { %s431_s12 = sadd.s32 1, %s392_s9   ;;  %s24_s13 = sadd.s32 1, %s388_s8 }
   0x7   : > { %s21_s14 = ssub.s32 %s392_s9, %s431_s12  ;;  %p31_p0 = scmp.ne.s32.totalorder %s388_s8, %s384_s7 }
   0x8   : > { %p22_p1 = scmp.eq.s32.totalorder %s21_s14, 0  ;;  %p32_p2 = scmp.eq.s32.totalorder %s392_s9, 0 }
   0x9   : > { %p37_p3 = scmp.ne.s32.totalorder %s384_s7, %s380_s6  ;;  %p38_p4 = scmp.eq.s32.totalorder %s427_s10, 0 }
   0xa   : > { %s443_s15 = scalar_select %p22_p1, %s388_s8, %s24_s13  }
   0xb   : > { %p445_p5 = por %p32_p2, %p31_p0  ;;  %p449_p6 = por %p38_p4, %p37_p3 }
   0xc   : > { %p61_p7 = scmp.eq.s32.totalorder %s427_s10, 1  ;;  %p67_p8 = scmp.eq.s32.totalorder %s232_s11, 1 }
   0xd   : > { %p260_p10 = scmp.lt.s32.totalorder %s392_s9, 2  ;;  %s87_s20 = sand.u32 1, %s388_s8  }
   0xe   : > { %p456_p11 = por %p61_p7, %p31_p0  ;;  %p460_p12 = por %p67_p8, %p37_p3 }
   0xf   : > { %s246_s21 = sshll.u32 %s392_s9, 8  ;;  %s235_s22 = sshll.u32 %s87_s20, 4 }
  0x10   : > { %s572_s18 = scalar_select %p456_p11, 1, 0 }
  0x11   : > { %s573_s19 = scalar_select %p460_p12, 1, 0 }
  0x12   : > { %s469_s25 = scalar_lea.hbm %s567_s0, %s246_s21  ;;  %s91_s26 = scalar_lea.vmem [#allocation2], %s235_s22 }
  0x13   : > { %s99_s27 = sshll.u32 %s91_s26, 4  ;;  %p473_p13 = pnand %p260_p10, %p445_p5  ;;  %s477_s27 = int_to_ptr.vmem [resolvable:$true] %s99_s27 }
  0x14   : > { %s88_s29 = scalar_lea.sflag [#allocation3], %s87_s20  ;;  %s296_s30 = scalar_lea.hbm %s469_s25, 256 }
  0x15   : > { %p297_p2 = scmp.ne.s32.totalorder %s469_s25, %s296_s30  ;;  %p298_p3 = pneg %p473_p13 }
  0x16   : > { %s301_s4 = scalar_lea.hbm %s567_s0, 512  ;;  %p302_p5 = scmp.lt.u32.totalorder %s469_s25, %s567_s0 }
  0x17   : > { %p299_p4 = pnand %p298_p3, %p297_p2  ;;  %p303_p8 = scmp.lt.u32.totalorder %s301_s4, %s296_s30 }
  0x18   : > { %p305_p9 = scmp.lt.u32.totalorder %s296_s30, %s469_s25 }
  0x19   : > { %p300_p7 = pneg %p299_p4  ;;  %p304_p10 = por %p303_p8, %p302_p5 }
  0x1b   : > { %p306_p0 = por %p305_p9, %p304_p10 }
  0x1d   : > { %p307_p1 = pnand %p306_p0, %p300_p7 }
  0x1f   : > { %310 = shalt.err (!%p307_p1)
}
  0x20   : > { %s311_s13 = scalar_lea.vmem %s477_s27, 256  ;;  %s394_s14 = smov [#allocation2]  }
  0x21   : > { %p312_p2 = scmp.ne.s32.totalorder %s477_s27, %s311_s13  ;;  %s316_s16 = sshll.u32 %s394_s14, 4  ;;  %s317_s16 = int_to_ptr.vmem [resolvable:$false] %s316_s16 }
  0x22   : > { %s318_s20 = scalar_lea.vmem %s317_s16, 512  ;;  %p319_p11 = scmp.lt.s32.totalorder %s477_s27, %s317_s16 }
  0x23   : > { %p314_p4 = pnand %p312_p2, %p298_p3  ;;  %p320_p5 = scmp.lt.s32.totalorder %s318_s20, %s311_s13 }
  0x25   : > { %p315_p12 = pneg %p314_p4  ;;  %p321_p8 = por %p320_p5, %p319_p11 }
  0x27   : > { %p322_p9 = pnand %p321_p8, %p315_p12 }
  0x29   : > { %325 = shalt.err (!%p322_p9)
}
  0x2a   : > { %255 = dma.hbm_to_vmem [thread:$0]  (!%p473_p13), %s469_s25, 256, %s477_s27, %s88_s29  }
  0x2b   : > { %p575_p0 = scmp.lt.s32.totalorder %s392_s9, 3  ;;  %p576_p1 = scmp.ge.s32.totalorder %s392_s9, 1 }
  0x2d   : > { %p105_p3 = pnand %p576_p1, %p575_p0 }
  0x2e   : > { %s511_s21 = sand.u32 (!%p105_p3), 1, %s384_s7  }
  0x2f   : > { %108 = sbr.rel (%p105_p3) target bundleno = 233 (0xe9), region = 24  ;;  %s239_s22 = sshll.u32 (!%p105_p3), %s511_s21, 4 }
  0x30   : > { %s111_s23 = scalar_lea.sflag (!%p105_p3), [#allocation3], %s511_s21  ;;  %s114_s24 = scalar_lea.vmem (!%p105_p3), [#allocation2], %s239_s22 }
  0x36   : > { %371 = dma.done.wait (%p449_p6), %s111_s23, 256  }
  0x37   : > { %373 = vsyncadd (%p449_p6), %s111_s23, 4294967040  ;;  %v133_v0 = vld [vmem:[%s114_s24] sm:$0xff]  ;;  %v134_v1 = vld [vmem:[%s114_s24 + $0x8] sm:$0xff]  ;;  %s247_s25 = sshll.u32 %s427_s10, 8  ;;  %s132_s26 = scalar_lea.vmem [#allocation5], %s239_s22 }
  0x38   : > { %v135_v2 = vmul.f32 %v133_v0, %v133_v0  ;;  %v136_v3 = vmul.f32 %v134_v1, %v134_v1  ;;  %s162_s27 = sshll.u32 %s132_s26, 4  ;;  %s523_s29 = scalar_lea.hbm %s568_s1, %s247_s25  ;;  %s525_s27 = int_to_ptr.vmem [resolvable:$true] %s162_s27 }
  0x39   : > { %s148_s30 = scalar_lea.sflag [#allocation4], %s511_s21  ;;  %s326_s2 = scalar_lea.vmem %s525_s27, 256 }
  0x3a   : > { %v137_v4 = vadd.f32 %v136_v3, %v135_v2  ;;  %p327_p6 = scmp.ne.s32.totalorder %s525_s27, %s326_s2  ;;  %p577_p11 = scmp.ne.s32.totalorder %s572_s18, 0 }
  0x3b   : > { %s395_s10 = smov [#allocation5]  }
  0x3c   : > { %138 = vadd.xlane.f32.xlu0 %v137_v4  ;;  %p328_p12 = pnand %p327_p6, %p577_p11  ;;  %s330_s3 = sshll.u32 %s395_s10, 4  ;;  %s331_s3 = int_to_ptr.vmem [resolvable:$false] %s330_s3 }
  0x3d   : > { %s332_s4 = scalar_lea.vmem %s331_s3, 512  ;;  %p333_p7 = scmp.lt.s32.totalorder %s525_s27, %s331_s3 }
  0x3e   : > { %p329_p13 = pneg %p328_p12  ;;  %p334_p10 = scmp.lt.s32.totalorder %s332_s4, %s326_s2 }
  0x40   : > { %p335_p2 = por %p334_p10, %p333_p7 }
  0x42   : > { %p336_p4 = pnand %p335_p2, %p329_p13 }
  0xc9   : > { %v139_v5 = vpop.xlane.xlu0 %138 }
  0xca   : > { %v140_v6 = vmul.f32 0.00390625, %v139_v5 }
  0xcc   : > { %v141_v7 = vadd.f32 1e-12, %v140_v6 }
  0xce   : > { %294 = vrsqrt.f32 %v141_v7 }
  0xd8   : > { %v295_v8 = vpop.eup %294 }
  0xd9   : > { %v143_v9 = vmul.f32 %v295_v8, %v133_v0  ;;  %v144_v10 = vmul.f32 %v295_v8, %v134_v1 }
  0xdb   : > { %145 = vst [vmem:[%s132_s26] sm:$0xff] %v143_v9  ;;  %146 = vst [vmem:[%s132_s26 + $0x8] sm:$0xff] %v144_v10 }
  0xdc   : > { %339 = shalt.err (!%p336_p4)
}
  0xdd   : > { %s340_s5 = scalar_lea.hbm %s523_s29, 256  ;;  %s344_s14 = scalar_lea.hbm %s568_s1, 512 }
  0xde   : > { %p341_p5 = scmp.ne.s32.totalorder %s523_s29, %s340_s5  ;;  %p345_p0 = scmp.lt.u32.totalorder %s523_s29, %s568_s1 }
  0xdf   : > { %p346_p1 = scmp.lt.u32.totalorder %s344_s14, %s340_s5  ;;  %p348_p6 = scmp.lt.u32.totalorder %s340_s5, %s523_s29 }
  0xe0   : > { %p342_p8 = pnand %p341_p5, %p577_p11 }
  0xe1   : > { %p347_p3 = por %p346_p1, %p345_p0 }
  0xe2   : > { %p343_p9 = pneg %p342_p8 }
  0xe3   : > { %p349_p12 = por %p348_p6, %p347_p3 }
  0xe5   : > { %p350_p13 = pnand %p349_p12, %p343_p9 }
  0xe7   : > { %353 = shalt.err (!%p350_p13)
}
  0xe8   : > { %250 = dma.vmem_to_hbm [thread:$0]  (%p577_p11), %s525_s27, 256, %s523_s29, %s148_s30  }
  0xe9 PF: > { %s174_s21 = sand.u32 1, %s380_s6   ;;  %p578_p7 = scmp.ne.s32.totalorder %s573_s19, 0 }
  0xea   : > { %p579_p10 = scmp.ge.s32.totalorder %s392_s9, 2  ;;  %s175_s22 = scalar_lea.sflag [#allocation4], %s174_s21 }
  0xec   : > { %p257_p2 = pnand %p579_p10, %p578_p7 }
  0xee   : > { %375 = dma.done.wait (!%p257_p2), %s175_s22, 256  }
  0xef   : > { %377 = vsyncadd (!%p257_p2), %s175_s22, 4294967040  ;;  %p14_p4 = scmp.ge.s32.totalorder %s431_s12, 4   ;;  %s580_s6 = smov %s384_s7 }
  0xf0   : > { %s581_s7 = smov %s388_s8  ;;  %s582_s8 = smov %s443_s15 }
  0xf1   : > { %s583_s9 = smov %s431_s12  ;;  %16 = sbr.rel (!%p14_p4) target bundleno = 5 (0x5), region = 69 }
  0xf8   :  { %180 = vsyncpa [#allocation3], 1 }
  0xf9   :  { %182 = vsyncpa [#allocation3 + $0x1], 1 }
  0xfa   :  { %183 = vsyncpa [#allocation4], 1 }
  0xfb   :  { %185 = vsyncpa [#allocation4 + $0x1], 1 }

</bundles_post_ra>
